<compile_context>
chip_gen: v6e
topology: v6e:2x2x1
jax: 0.10.0
libtpu: 0.0.40
codegen_flags: <defaults>
</compile_context>

<pallas_src>
import jax
import jax.numpy as jnp
from jax.experimental import pallas as pl
from jax.experimental.pallas import tpu as pltpu


def _round_up(n, m):
    return (n + m - 1) // m * m


def _cdiv(a, b):
    return -(-a // b)


def _resident_spec(shape, index_map, single_buffer):
    """BlockSpec for an operand whose block never changes across the grid.

    Requests single-buffering (saves VMEM, esp. on v7x's 64 MiB/TC) when the
    installed Pallas exposes pipeline_mode; otherwise falls back to default.
    """
    if single_buffer and hasattr(pl, "Buffered"):
        try:
            return pl.BlockSpec(shape, index_map, pipeline_mode=pl.Buffered(1))
        except TypeError:
            pass
    return pl.BlockSpec(shape, index_map)


def _make_kernel(has_shortcut):
    if has_shortcut:
        def kernel(x_ref, w0_ref, b0_ref, w1_ref, b1_ref, wsc_ref, o_ref):
            x = x_ref[...]                                   # bf16 (tm, Cin)
            h0 = jnp.maximum(x, 0)                           # bf16 MXU operand
            net = jnp.dot(h0, w0_ref[...],
                          preferred_element_type=jnp.float32) + b0_ref[...]
            h1 = jnp.maximum(net, 0.0).astype(jnp.bfloat16)
            y = jnp.dot(h1, w1_ref[...], preferred_element_type=jnp.float32)
            y = y + jnp.dot(x, wsc_ref[...],                 # projection shortcut (raw x)
                            preferred_element_type=jnp.float32)
            o_ref[...] = (y + b1_ref[...]).astype(o_ref.dtype)
    else:
        def kernel(x_ref, w0_ref, b0_ref, w1_ref, b1_ref, o_ref):
            x = x_ref[...]                                   # bf16 (tm, C)
            h0 = jnp.maximum(x, 0)
            net = jnp.dot(h0, w0_ref[...],
                          preferred_element_type=jnp.float32) + b0_ref[...]
            h1 = jnp.maximum(net, 0.0).astype(jnp.bfloat16)
            y = jnp.dot(h1, w1_ref[...], preferred_element_type=jnp.float32)
            o_ref[...] = (y + b1_ref[...] + x.astype(jnp.float32)  # identity residual, f32
                          ).astype(o_ref.dtype)
    return kernel


def resnet_block_fc(x, params, *, row_tile=1024, out_dtype=jnp.bfloat16):
    """x: (..., size_in). Returns (..., size_out) in `out_dtype` (default bf16)."""
    w_fc0, b_fc0 = params["w_fc0"], params["b_fc0"]
    w_fc1, b_fc1 = params["w_fc1"], params["b_fc1"]
    w_sc = params.get("w_sc", None)

    size_in, size_h = w_fc0.shape
    size_out = w_fc1.shape[1]
    has_shortcut = w_sc is not None
    if not has_shortcut:
        assert size_in == size_out, "identity shortcut requires size_in == size_out"

    lead_shape = x.shape[:-1]
    n = 1
    for d in lead_shape:
        n *= d
    n = max(int(n), 1)

    # bf16 at the HBM boundary; no channel padding, no row re-materialization.
    x2 = x.reshape(n, size_in).astype(jnp.bfloat16)

    # Row tiling: tm is a multiple of 8 sublanes; the (possibly partial) last
    # block is handled by Pallas (rows are fully independent, OOB writes are
    # masked).  Keep >= 2 grid programs when there is enough work so both v7x
    # TensorCores get a share under dimension_semantics=("parallel",).
    row_tile = max(8, _round_up(int(row_tile), 8))
    tm = min(row_tile, _round_up(n, 8))
    if n > 16 and _cdiv(n, tm) < 2:
        tm = _round_up(_cdiv(n, 2), 8)
    grid = (_cdiv(n, tm),)

    # Resident operands: bf16 weights for the MXU, f32 (1, C) bias rows.
    w0 = w_fc0.astype(jnp.bfloat16)
    w1 = w_fc1.astype(jnp.bfloat16)
    b0 = b_fc0.reshape(1, size_h).astype(jnp.float32)
    b1 = b_fc1.reshape(1, size_out).astype(jnp.float32)

    operands = [x2, w0, b0, w1, b1]
    if has_shortcut:
        operands.append(w_sc.astype(jnp.bfloat16))

    out_itemsize = jnp.dtype(out_dtype).itemsize

    # Advisory cost estimate.
    flops = 2 * n * (size_in * size_h + size_h * size_out
                     + (size_in * size_out if has_shortcut else 0))
    weight_bytes = ((w0.size + w1.size + (w_sc.size if has_shortcut else 0)) * 2
                    + (b0.size + b1.size) * 4)
    bytes_accessed = n * size_in * 2 + n * size_out * out_itemsize + weight_bytes
    cost = pl.CostEstimate(flops=flops, transcendentals=0,
                           bytes_accessed=bytes_accessed)

    # VMEM budget: double-buffered streaming x/out tiles + (at most double-
    # buffered) resident weights + in-kernel intermediates, clamped to ~75%
    # of this chip's VMEM capacity (128 MiB v5e/v6e, 64 MiB per TC on v7x).
    try:
        vmem_cap = int(pltpu.get_tpu_info().vmem_capacity_bytes)
    except Exception:  # pragma: no cover - conservative fallback
        vmem_cap = 64 * 1024 * 1024
    stream_bytes = 2 * tm * (size_in * 2 + size_out * out_itemsize)
    scratch_bytes = tm * (2 * size_h + 2 * size_out) * 4
    vmem_limit = int(min(0.75 * vmem_cap,
                         stream_bytes + 2 * weight_bytes + scratch_bytes + (8 << 20)))

    def _call(single_buffer_weights):
        in_specs = [
            pl.BlockSpec((tm, size_in), lambda i: (i, 0)),           # streamed x tile
            _resident_spec((size_in, size_h), lambda i: (0, 0), single_buffer_weights),
            _resident_spec((1, size_h), lambda i: (0, 0), single_buffer_weights),
            _resident_spec((size_h, size_out), lambda i: (0, 0), single_buffer_weights),
            _resident_spec((1, size_out), lambda i: (0, 0), single_buffer_weights),
        ]
        if has_shortcut:
            in_specs.append(
                _resident_spec((size_in, size_out), lambda i: (0, 0),
                               single_buffer_weights))
        return pl.pallas_call(
            _make_kernel(has_shortcut),
            out_shape=jax.ShapeDtypeStruct((n, size_out), out_dtype),
            grid=grid,
            in_specs=in_specs,
            out_specs=pl.BlockSpec((tm, size_out), lambda i: (i, 0)),
            compiler_params=pltpu.CompilerParams(
                dimension_semantics=("parallel",),
                vmem_limit_bytes=vmem_limit),
            cost_estimate=cost,
        )(*operands)

    try:
        out = _call(single_buffer_weights=True)
    except Exception:
        # Some Pallas builds reject pipeline_mode / Buffered(1) on resident
        # operands; retry with default double-buffering (correctness identical).
        out = _call(single_buffer_weights=False)

    return out.reshape(*lead_shape, size_out)


# ----------------------------- reference & params ------------------------------

def reference(x, params):
    """Pure-JAX f32 mirror of the PyTorch forward."""
    h0 = jnp.maximum(x, 0.0)
    net = h0 @ params["w_fc0"] + params["b_fc0"]
    h1 = jnp.maximum(net, 0.0)
    dx = h1 @ params["w_fc1"] + params["b_fc1"]
    if params.get("w_sc") is not None:
        x_s = x @ params["w_sc"]
    else:
        x_s = x
    return x_s + dx


def init_params(key, size_in, size_out=None, size_h=None, zero_init_fc1=False):
    """Weights stored (in, out), i.e. transposed vs. PyTorch nn.Linear.weight."""
    if size_out is None:
        size_out = size_in
    if size_h is None:
        size_h = min(size_in, size_out)
    keys = jax.random.split(key, 5)

    def w(k, ci, co):
        return jax.random.normal(k, (ci, co), jnp.float32) * 0.1

    params = {
        "w_fc0": w(keys[0], size_in, size_h),
        "b_fc0": jax.random.normal(keys[1], (size_h,), jnp.float32) * 0.1,
        # The PyTorch module zero-inits fc_1.weight at construction; the forward
        # math is identical either way, so both zero and random w_fc1 are tested.
        "w_fc1": (jnp.zeros((size_h, size_out), jnp.float32) if zero_init_fc1
                  else w(keys[2], size_h, size_out)),
        "b_fc1": jax.random.normal(keys[3], (size_out,), jnp.float32) * 0.1,
        "w_sc": w(keys[4], size_in, size_out) if size_in != size_out else None,
    }
    return params


if __name__ == "__main__":
    key = jax.random.PRNGKey(0)
    kx1, kp1, kx2, kp2 = jax.random.split(key, 4)

    B, T = 2, 16

    # Case 1: projection shortcut (size_in != size_out), random fc_1 weight.
    size_in, size_h, size_out = 32, 64, 48
    x1 = jax.random.normal(kx1, (B, T, size_in), jnp.float32)
    p1 = init_params(kp1, size_in, size_out, size_h)
    out1 = jax.block_until_ready(resnet_block_fc(x1, p1))
    ref1 = reference(x1, p1)
    assert out1.shape == (B, T, size_out)
    # bf16 activations/weights at the HBM boundary and bf16 output vs f32 ref.
    err1 = float(jnp.max(jnp.abs(out1.astype(jnp.float32) - ref1)))
    assert err1 < 1e-1, err1

    # Case 2: identity shortcut (size_in == size_out), constructor-faithful
    # zero-initialized fc_1 weight.
    x2 = jax.random.normal(kx2, (B, T, 32), jnp.float32)
    p2 = init_params(kp2, 32, 32, 32, zero_init_fc1=True)
    out2 = jax.block_until_ready(resnet_block_fc(x2, p2))
    ref2 = reference(x2, p2)
    assert out2.shape == (B, T, 32)
    err2 = float(jnp.max(jnp.abs(out2.astype(jnp.float32) - ref2)))
    assert err2 < 1e-1, err2

    print("KERNEL_OK")
</pallas_src>

<mosaic_0001>
module attributes {stable_mosaic.version = 11 : i64} {
  func.func @kernel(%arg0: i32, %arg1: memref<16x32xbf16, #tpu.memory_space<vmem>>, %arg2: memref<32x64xbf16, #tpu.memory_space<vmem>>, %arg3: memref<1x64xf32, #tpu.memory_space<vmem>>, %arg4: memref<64x48xbf16, #tpu.memory_space<vmem>>, %arg5: memref<1x48xf32, #tpu.memory_space<vmem>>, %arg6: memref<32x48xbf16, #tpu.memory_space<vmem>>, %arg7: memref<16x48xbf16, #tpu.memory_space<vmem>>) attributes {dimension_semantics = [#tpu.dimension_semantics<parallel>], iteration_bounds = array<i64: 2>, scalar_prefetch = 0 : i64, scratch_operands = 0 : i64, tpu.core_type = #tpu.core_type<tc>, window_params = [{transform_indices = @transform_0, window_bounds = array<i64: 16, 32>}, {pipeline_mode = #tpu.pipeline_mode<synchronous>, transform_indices = @transform_1, window_bounds = array<i64: 32, 64>}, {pipeline_mode = #tpu.pipeline_mode<synchronous>, transform_indices = @transform_2, window_bounds = array<i64: 1, 64>}, {pipeline_mode = #tpu.pipeline_mode<synchronous>, transform_indices = @transform_3, window_bounds = array<i64: 64, 48>}, {pipeline_mode = #tpu.pipeline_mode<synchronous>, transform_indices = @transform_4, window_bounds = array<i64: 1, 48>}, {pipeline_mode = #tpu.pipeline_mode<synchronous>, transform_indices = @transform_5, window_bounds = array<i64: 32, 48>}, {transform_indices = @transform_6, window_bounds = array<i64: 16, 48>}]} {
    %c0 = arith.constant 0 : index
    %c0_0 = arith.constant 0 : index
    %0 = vector.load %arg1[%c0, %c0_0] : memref<16x32xbf16, #tpu.memory_space<vmem>>, vector<16x32xbf16>
    %cst = arith.constant 0.000000e+00 : bf16
    %1 = vector.broadcast %cst : bf16 to vector<16x32xbf16>
    %2 = arith.maximumf %0, %1 : vector<16x32xbf16>
    %c0_1 = arith.constant 0 : index
    %c0_2 = arith.constant 0 : index
    %3 = vector.load %arg2[%c0_1, %c0_2] : memref<32x64xbf16, #tpu.memory_space<vmem>>, vector<32x64xbf16>
    %cst_3 = arith.constant dense<0.000000e+00> : vector<16x64xf32>
    %4 = tpu.matmul %2, %3, %cst_3 {dimension_numbers = #tpu.dot_dimension_numbers<[1], [0], [0], [1], [0, 0, 1, 1], [], []>} : vector<16x32xbf16>, vector<32x64xbf16>, vector<16x64xf32> -> vector<16x64xf32>
    %c0_4 = arith.constant 0 : index
    %c0_5 = arith.constant 0 : index
    %5 = vector.load %arg3[%c0_4, %c0_5] : memref<1x64xf32, #tpu.memory_space<vmem>>, vector<1x64xf32>
    %6 = vector.broadcast %5 : vector<1x64xf32> to vector<16x64xf32>
    %7 = arith.addf %4, %6 : vector<16x64xf32>
    %cst_6 = arith.constant 0.000000e+00 : f32
    %8 = vector.broadcast %cst_6 : f32 to vector<16x64xf32>
    %9 = arith.maximumf %7, %8 : vector<16x64xf32>
    %10 = arith.truncf %9 : vector<16x64xf32> to vector<16x64xbf16>
    %c0_7 = arith.constant 0 : index
    %c0_8 = arith.constant 0 : index
    %11 = vector.load %arg4[%c0_7, %c0_8] : memref<64x48xbf16, #tpu.memory_space<vmem>>, vector<64x48xbf16>
    %cst_9 = arith.constant dense<0.000000e+00> : vector<16x48xf32>
    %12 = tpu.matmul %10, %11, %cst_9 {dimension_numbers = #tpu.dot_dimension_numbers<[1], [0], [0], [1], [0, 0, 1, 1], [], []>} : vector<16x64xbf16>, vector<64x48xbf16>, vector<16x48xf32> -> vector<16x48xf32>
    %c0_10 = arith.constant 0 : index
    %c0_11 = arith.constant 0 : index
    %13 = vector.load %arg6[%c0_10, %c0_11] : memref<32x48xbf16, #tpu.memory_space<vmem>>, vector<32x48xbf16>
    %cst_12 = arith.constant dense<0.000000e+00> : vector<16x48xf32>
    %14 = tpu.matmul %0, %13, %cst_12 {dimension_numbers = #tpu.dot_dimension_numbers<[1], [0], [0], [1], [0, 0, 1, 1], [], []>} : vector<16x32xbf16>, vector<32x48xbf16>, vector<16x48xf32> -> vector<16x48xf32>
    %15 = arith.addf %12, %14 : vector<16x48xf32>
    %c0_13 = arith.constant 0 : index
    %c0_14 = arith.constant 0 : index
    %16 = vector.load %arg5[%c0_13, %c0_14] : memref<1x48xf32, #tpu.memory_space<vmem>>, vector<1x48xf32>
    %17 = vector.broadcast %16 : vector<1x48xf32> to vector<16x48xf32>
    %18 = arith.addf %15, %17 : vector<16x48xf32>
    %19 = arith.truncf %18 : vector<16x48xf32> to vector<16x48xbf16>
    %c0_15 = arith.constant 0 : index
    %c0_16 = arith.constant 0 : index
    %20 = vector.load %arg7[%c0_15, %c0_16] : memref<16x48xbf16, #tpu.memory_space<vmem>>, vector<16x48xbf16>
    tpu.vector_store %arg7[%c0_15, %c0_16], %19 {strides = array<i32>} : memref<16x48xbf16, #tpu.memory_space<vmem>>, vector<16x48xbf16>,
    return
  }
  func.func @transform_0(%arg0: i32) -> (i32, i32) {
    %c0_i32 = arith.constant 0 : i32
    %c0_i32_0 = arith.constant 0 : i32
    return %arg0, %c0_i32 : i32, i32
  }
  func.func @transform_1(%arg0: i32) -> (i32, i32) {
    %c0_i32 = arith.constant 0 : i32
    %c0_i32_0 = arith.constant 0 : i32
    %c0_i32_1 = arith.constant 0 : i32
    return %c0_i32, %c0_i32_0 : i32, i32
  }
  func.func @transform_2(%arg0: i32) -> (i32, i32) {
    %c0_i32 = arith.constant 0 : i32
    %c0_i32_0 = arith.constant 0 : i32
    %c0_i32_1 = arith.constant 0 : i32
    return %c0_i32, %c0_i32_0 : i32, i32
  }
  func.func @transform_3(%arg0: i32) -> (i32, i32) {
    %c0_i32 = arith.constant 0 : i32
    %c0_i32_0 = arith.constant 0 : i32
    %c0_i32_1 = arith.constant 0 : i32
    return %c0_i32, %c0_i32_0 : i32, i32
  }
  func.func @transform_4(%arg0: i32) -> (i32, i32) {
    %c0_i32 = arith.constant 0 : i32
    %c0_i32_0 = arith.constant 0 : i32
    %c0_i32_1 = arith.constant 0 : i32
    return %c0_i32, %c0_i32_0 : i32, i32
  }
  func.func @transform_5(%arg0: i32) -> (i32, i32) {
    %c0_i32 = arith.constant 0 : i32
    %c0_i32_0 = arith.constant 0 : i32
    %c0_i32_1 = arith.constant 0 : i32
    return %c0_i32, %c0_i32_0 : i32, i32
  }
  func.func @transform_6(%arg0: i32) -> (i32, i32) {
    %c0_i32 = arith.constant 0 : i32
    %c0_i32_0 = arith.constant 0 : i32
    return %arg0, %c0_i32 : i32, i32
  }
}

module attributes {stable_mosaic.version = 11 : i64} {
  func.func @kernel(%arg0: i32, %arg1: memref<16x32xbf16, #tpu.memory_space<vmem>>, %arg2: memref<32x64xbf16, #tpu.memory_space<vmem>>, %arg3: memref<1x64xf32, #tpu.memory_space<vmem>>, %arg4: memref<64x48xbf16, #tpu.memory_space<vmem>>, %arg5: memref<1x48xf32, #tpu.memory_space<vmem>>, %arg6: memref<32x48xbf16, #tpu.memory_space<vmem>>, %arg7: memref<16x48xbf16, #tpu.memory_space<vmem>>) attributes {dimension_semantics = [#tpu.dimension_semantics<parallel>], iteration_bounds = array<i64: 2>, scalar_prefetch = 0 : i64, scratch_operands = 0 : i64, tpu.core_type = #tpu.core_type<tc>, window_params = [{transform_indices = @transform_0, window_bounds = array<i64: 16, 32>}, {pipeline_mode = #tpu.pipeline_mode<synchronous>, transform_indices = @transform_1, window_bounds = array<i64: 32, 64>}, {pipeline_mode = #tpu.pipeline_mode<synchronous>, transform_indices = @transform_2, window_bounds = array<i64: 1, 64>}, {pipeline_mode = #tpu.pipeline_mode<synchronous>, transform_indices = @transform_3, window_bounds = array<i64: 64, 48>}, {pipeline_mode = #tpu.pipeline_mode<synchronous>, transform_indices = @transform_4, window_bounds = array<i64: 1, 48>}, {pipeline_mode = #tpu.pipeline_mode<synchronous>, transform_indices = @transform_5, window_bounds = array<i64: 32, 48>}, {transform_indices = @transform_6, window_bounds = array<i64: 16, 48>}]} {
    %c0 = arith.constant 0 : index
    %c0_0 = arith.constant 0 : index
    %0 = vector.load %arg1[%c0, %c0_0] : memref<16x32xbf16, #tpu.memory_space<vmem>>, vector<16x32xbf16>
    %cst = arith.constant 0.000000e+00 : bf16
    %1 = vector.broadcast %cst : bf16 to vector<16x32xbf16>
    %2 = arith.maximumf %0, %1 : vector<16x32xbf16>
    %c0_1 = arith.constant 0 : index
    %c0_2 = arith.constant 0 : index
    %3 = vector.load %arg2[%c0_1, %c0_2] : memref<32x64xbf16, #tpu.memory_space<vmem>>, vector<32x64xbf16>
    %cst_3 = arith.constant dense<0.000000e+00> : vector<16x64xf32>
    %4 = tpu.matmul %2, %3, %cst_3 {dimension_numbers = #tpu.dot_dimension_numbers<[1], [0], [0], [1], [0, 0, 1, 1], [], []>} : vector<16x32xbf16>, vector<32x64xbf16>, vector<16x64xf32> -> vector<16x64xf32>
    %c0_4 = arith.constant 0 : index
    %c0_5 = arith.constant 0 : index
    %5 = vector.load %arg3[%c0_4, %c0_5] : memref<1x64xf32, #tpu.memory_space<vmem>>, vector<1x64xf32>
    %6 = vector.broadcast %5 : vector<1x64xf32> to vector<16x64xf32>
    %7 = arith.addf %4, %6 : vector<16x64xf32>
    %cst_6 = arith.constant 0.000000e+00 : f32
    %8 = vector.broadcast %cst_6 : f32 to vector<16x64xf32>
    %9 = arith.maximumf %7, %8 : vector<16x64xf32>
    %10 = arith.truncf %9 : vector<16x64xf32> to vector<16x64xbf16>
    %c0_7 = arith.constant 0 : index
    %c0_8 = arith.constant 0 : index
    %11 = vector.load %arg4[%c0_7, %c0_8] : memref<64x48xbf16, #tpu.memory_space<vmem>>, vector<64x48xbf16>
    %cst_9 = arith.constant dense<0.000000e+00> : vector<16x48xf32>
    %12 = tpu.matmul %10, %11, %cst_9 {dimension_numbers = #tpu.dot_dimension_numbers<[1], [0], [0], [1], [0, 0, 1, 1], [], []>} : vector<16x64xbf16>, vector<64x48xbf16>, vector<16x48xf32> -> vector<16x48xf32>
    %c0_10 = arith.constant 0 : index
    %c0_11 = arith.constant 0 : index
    %13 = vector.load %arg6[%c0_10, %c0_11] : memref<32x48xbf16, #tpu.memory_space<vmem>>, vector<32x48xbf16>
    %cst_12 = arith.constant dense<0.000000e+00> : vector<16x48xf32>
    %14 = tpu.matmul %0, %13, %cst_12 {dimension_numbers = #tpu.dot_dimension_numbers<[1], [0], [0], [1], [0, 0, 1, 1], [], []>} : vector<16x32xbf16>, vector<32x48xbf16>, vector<16x48xf32> -> vector<16x48xf32>
    %15 = arith.addf %12, %14 : vector<16x48xf32>
    %c0_13 = arith.constant 0 : index
    %c0_14 = arith.constant 0 : index
    %16 = vector.load %arg5[%c0_13, %c0_14] : memref<1x48xf32, #tpu.memory_space<vmem>>, vector<1x48xf32>
    %17 = vector.broadcast %16 : vector<1x48xf32> to vector<16x48xf32>
    %18 = arith.addf %15, %17 : vector<16x48xf32>
    %19 = arith.truncf %18 : vector<16x48xf32> to vector<16x48xbf16>
    %c0_15 = arith.constant 0 : index
    %c0_16 = arith.constant 0 : index
    %20 = vector.load %arg7[%c0_15, %c0_16] : memref<16x48xbf16, #tpu.memory_space<vmem>>, vector<16x48xbf16>
    tpu.vector_store %arg7[%c0_15, %c0_16], %19 {strides = array<i32>} : memref<16x48xbf16, #tpu.memory_space<vmem>>, vector<16x48xbf16>,
    return
  }
  func.func @transform_0(%arg0: i32) -> (i32, i32) {
    %c0_i32 = arith.constant 0 : i32
    %c0_i32_0 = arith.constant 0 : i32
    return %arg0, %c0_i32 : i32, i32
  }
  func.func @transform_1(%arg0: i32) -> (i32, i32) {
    %c0_i32 = arith.constant 0 : i32
    %c0_i32_0 = arith.constant 0 : i32
    %c0_i32_1 = arith.constant 0 : i32
    return %c0_i32, %c0_i32_0 : i32, i32
  }
  func.func @transform_2(%arg0: i32) -> (i32, i32) {
    %c0_i32 = arith.constant 0 : i32
    %c0_i32_0 = arith.constant 0 : i32
    %c0_i32_1 = arith.constant 0 : i32
    return %c0_i32, %c0_i32_0 : i32, i32
  }
  func.func @transform_3(%arg0: i32) -> (i32, i32) {
    %c0_i32 = arith.constant 0 : i32
    %c0_i32_0 = arith.constant 0 : i32
    %c0_i32_1 = arith.constant 0 : i32
    return %c0_i32, %c0_i32_0 : i32, i32
  }
  func.func @transform_4(%arg0: i32) -> (i32, i32) {
    %c0_i32 = arith.constant 0 : i32
    %c0_i32_0 = arith.constant 0 : i32
    %c0_i32_1 = arith.constant 0 : i32
    return %c0_i32, %c0_i32_0 : i32, i32
  }
  func.func @transform_5(%arg0: i32) -> (i32, i32) {
    %c0_i32 = arith.constant 0 : i32
    %c0_i32_0 = arith.constant 0 : i32
    %c0_i32_1 = arith.constant 0 : i32
    return %c0_i32, %c0_i32_0 : i32, i32
  }
  func.func @transform_6(%arg0: i32) -> (i32, i32) {
    %c0_i32 = arith.constant 0 : i32
    %c0_i32_0 = arith.constant 0 : i32
    return %arg0, %c0_i32 : i32, i32
  }
}

</mosaic_0001>

<bundles_post_ra>
// kernel: tpu_custom_call.1
= control target key start
LH: loop header
LB: loop body
LE: loop exit
PB: predicated region body
PF: predicated region fallthrough
CT: control target
= control target key end

     0   :  { %11 = vsyncpa [#allocation3], 0  ;;  %s933_s0 = inlined_call_operand.vmem [shape: bf16[32,32], index: 0, kind: input, shape index: {}]   ;;  %s934_s1 = inlined_call_operand.vmem [shape: bf16[32,64], index: 1, kind: input, shape index: {}]   ;;  %s935_s2 = inlined_call_operand.vmem [shape: f32[1,64], index: 2, kind: input, shape index: {}]   ;;  %s936_s3 = inlined_call_operand.vmem [shape: bf16[64,48], index: 3, kind: input, shape index: {}]   ;;  %s937_s4 = inlined_call_operand.vmem [shape: f32[1,48], index: 4, kind: input, shape index: {}]   ;;  %s938_s5 = inlined_call_operand.vmem [shape: bf16[32,48], index: 5, kind: input, shape index: {}]   ;;  %s939_s6 = inlined_call_operand.hbm [shape: bf16[32,48], index: 6, kind: output, shape index: {}]  }
   0x1   :  { %13 = vsyncpa [#allocation3 + $0x1], 0  ;;  %s799_s21 = smov 0   ;;  %s801_s22 = smov 0  }
   0x2   :  { %s803_s23 = smov 0   ;;  %s805_s24 = smov 0  }
   0x3 LB: > { %s820_s25 = sadd.s32 4294967295, %s756_s24   ;;  %s572_s26 = sadd.s32 4294967294, %s756_s24   ;;  %s756_s24 = sphi %s805_s24, %s945_s24   ;;  %s752_s23 = sphi %s803_s23, %s944_s23   ;;  %s748_s22 = sphi %s801_s22, %s943_s22   ;;  %s744_s21 = sphi %s799_s21, %s942_s21  }
   0x4   : > { %s824_s27 = sadd.s32 1, %s756_s24   ;;  %s157_s28 = sadd.s32 1, %s752_s23 }
   0x5   : > { %s154_s29 = ssub.s32 %s756_s24, %s824_s27  ;;  %p167_p0 = scmp.ne.s32.totalorder %s752_s23, %s748_s22 }
   0x6   : > { %p155_p1 = scmp.eq.s32.totalorder %s154_s29, 0  ;;  %p168_p2 = scmp.eq.s32.totalorder %s820_s25, 1 }
   0x7   : > { %p173_p3 = scmp.ne.s32.totalorder %s748_s22, %s744_s21  ;;  %p174_p4 = scmp.eq.s32.totalorder %s572_s26, 1 }
   0x8   : > { %s835_s30 = scalar_select %p155_p1, %s752_s23, %s157_s28  }
   0x9   : > { %p837_p5 = por %p168_p2, %p167_p0  ;;  %p841_p6 = por %p174_p4, %p173_p3 }
   0xa   : > { %p575_p7 = scmp.ge.s32.totalorder %s756_s24, 1  ;;  %p216_p8 = scmp.lt.s32.totalorder %s756_s24, 3 }
   0xc   : > { %p217_p9 = pnand %p575_p7, %p216_p8 }
   0xd   : > { %s577_s13 = sshll.u32 (!%p217_p9), %s820_s25, 1  ;;  %s243_s17 = sand.u32 (!%p217_p9), 1, %s748_s22  }
   0xe   : > { %220 = sbr.rel (%p217_p9) target bundleno = 448 (0x1c0), region = 44  ;;  %p247_p10 = scmp.lt.s32.totalorder (!%p217_p9), %s577_s13, 3 }
   0xf   : > { %s576_s20 = sshll.u32 (!%p217_p9), %s243_s17, 3  ;;  %s603_s26 = sshll.u32 (!%p217_p9), %s820_s25, 7 }
  0x10   : > { %s245_s28 = scalar_lea.vmem (!%p217_p9), [#allocation2], %s576_s20  ;;  %s889_s11 = scalar_lea.hbm (!%p217_p9), %s939_s6, %s603_s26 }
  0x11   : > { %s510_s29 = sshll.u32 (!%p217_p9), %s245_s28, 4  ;;  %s893_s12 = scalar_lea.sflag (!%p217_p9), [#allocation3], %s243_s17  ;;  %s891_s29 = int_to_ptr.vmem [resolvable:$true] %s510_s29 }
  0x12   : > { %s696_s25 = scalar_lea.vmem (!%p217_p9), %s891_s29, 128 }
  0x13   : > { %v687_v0 = vld [vmem:[%s934_s1 + $0x8] sm:$0xff]   ;;  %v758_v1 = vmov 0.0   ;;  %v688_v2 = vld [vmem:[%s934_s1] sm:$0xff]   ;;  %vm759_vm0 = vmmov 0   ;;  %v690_v3 = vld [vmem:[%s936_s3 + $0x18] sm:$0xff]   ;;  %s947_s13 = smov (!%p247_p10, %s577_s13), 3  ;;  %p697_p11 = scmp.ne.s32.totalorder %s891_s29, %s696_s25 }
  0x14   : > { %615 = vmatprep.subr.bf16.mxu1 %v758_v1  ;;  %631 = vmatprep.subr.bf16.mxu0 %v758_v1  ;;  %s578_s16 = sshll.u32 %s947_s13, 2  ;;  %v760_v6 = vmov 0   ;;  %vm286_vm1 = vcmask 261120   ;;  %v691_v10 = vld [vmem:[%s938_s5 + $0x8] sm:$0xff]   ;;  %v692_v12 = vld [vmem:[%s936_s3 + $0x10] sm:$0xff]   ;;  %v693_v13 = vld [vmem:[%s938_s5] sm:$0xff]  }
  0x15   : > { %616 = vmatpush3.bf16.msra.mxu1 %v687_v0  ;;  %619 = vmatprep.mubr.msk.bf16.mxu1 %vm759_vm0, %v758_v1  ;;  %s250_s19 = scalar_lea.vmem %s933_s0, %s578_s16  ;;  %v694_v14 = vld [vmem:[%s936_s3 + $0x8] sm:$0xff]   ;;  %v695_v15 = vld [vmem:[%s936_s3] sm:$0xff]   ;;  %vm431_vm2 = vcmask 523264   ;;  %vm493_vm3 = vcmask 388096   ;;  %p698_p12 = pnand %p697_p11, %p837_p5 }
  0x16   : > { %617 = vmatprep.subr.bf16.mxu1 %v758_v1  ;;  %639 = vmatprep.mubr.msk.bf16.mxu0 %vm759_vm0, %v758_v1  ;;  %v254_v4 = vld [vmem:[%s250_s19] sm:$0xf]  ;;  %v255_v5 = vld [vmem:[%s250_s19 + $0x4] sm:$0xf]  ;;  %s761_s13 = smov [#allocation2]  }
  0x17   : > { %632 = vmatpush3.bf16.msra.mxu0 %v690_v3  ;;  %v256_v7 = vmax.bf16 %v760_v6, %v254_v4  ;;  %v257_v8 = vmax.bf16 %v760_v6, %v255_v5  ;;  %v584_v9 = vcombine.low %v254_v4, %v255_v5  ;;  %v579_v16 = vld [vmem:[%s935_s2] ss:$0 sm:$0xff]  ;;  %p699_p13 = pneg %p698_p12  ;;  %s700_s14 = sshll.u32 %s761_s13, 4  ;;  %s701_s14 = int_to_ptr.vmem [resolvable:$false] %s700_s14 }
  0x18   : > { %633 = vmatprep.subr.bf16.mxu0 %v758_v1  ;;  %v593_v31 = vld [vmem:[%s937_s4] ss:$0 sm:$0xff]  ;;  %s702_s15 = scalar_lea.vmem %s701_s14, 256  ;;  %p703_p0 = scmp.lt.s32.totalorder %s891_s29, %s701_s14 }
  0x19   : > { %618 = vmatpush3.bf16.msra.mxu1 %v688_v2  ;;  %v580_v11 = vcombine.low %v256_v7, %v257_v8  ;;  %p704_p1 = scmp.lt.s32.totalorder %s702_s15, %s696_s25 }
  0x1a   : > { %623 = vmatprep.subr.bf16.mxu1 %v758_v1 }
  0x1b   : > { %634 = vmatpush3.bf16.msra.mxu0 %v692_v12  ;;  %p705_p2 = por %p704_p1, %p703_p0 }
  0x1c   : > { %620 = vmatmul.mubr.msk.bf16.vlgmr.msra.gmra.mxu1 %vm286_vm1, %v580_v11  ;;  %635 = vmatprep.subr.bf16.mxu0 %v758_v1 }
  0x1d   : > { %624 = vmatpush3.bf16.msra.mxu1 %v691_v10  ;;  %627 = vmatprep.mubr.msk.bf16.mxu1 %vm759_vm0, %v758_v1  ;;  %p706_p3 = pnand %p705_p2, %p699_p13 }
  0x1e   : > { %625 = vmatprep.subr.bf16.mxu1 %v758_v1 }
  0x1f   : > { %636 = vmatpush3.bf16.msra.mxu0 %v694_v14 }
  0x20   : > { %637 = vmatprep.subr.bf16.mxu0 %v758_v1 }
  0x21   : > { %626 = vmatpush3.bf16.msra.mxu1 %v693_v13 }
  0x23   : > { %638 = vmatpush3.bf16.msra.mxu0 %v695_v15 }
  0x24   : > { %628 = vmatmul.mubr.msk.bf16.vlgmr.msra.gmra.mxu1 %vm286_vm1, %v584_v9 }
  0xdc   : > { %v324_v17 = vpop.f32.mrf.mxu1 }
  0xdd   : > { %v325_v19 = vadd.f32 %v579_v16, %v324_v17 }
  0xde   : > { %v621_v18 = vpop.f32.mrf.mxu1 }
  0xdf   : > { %v331_v23 = vmax.f32 %v325_v19, 0.0 }
  0xe0   : > { %v327_v20 = vpop.f32.mrf.mxu1 }
  0xe1   : > { %v328_v21 = vadd.f32 %v579_v16, %v327_v20 }
  0xe2   : > { %v622_v22 = vpop.f32.mrf.mxu1 }
  0xe3   : > { %v332_v24 = vmax.f32 %v328_v21, 0.0 }
  0xe4   : > { %v400_v26 = vpop.f32.mrf.mxu1 }
  0xe5   : > { %v333_v25 = vpack.c.bf16 %v332_v24, %v331_v23 }
  0xe6   : > { %v629_v27 = vpop.f32.mrf.mxu1 }
  0xe7   : > { %640 = vmatmul.mubr.msk.bf16.vlgmr.msra.gmra.mxu0 %vm431_vm2, %v333_v25 }
  0xe8   : > { %v403_v28 = vpop.f32.mrf.mxu1 }
  0xea   : > { %v630_v29 = vpop.f32.mrf.mxu1 }
 0x1a7   : > { %v469_v30 = vpop.f32.mrf.mxu0 }
 0x1a8   : > { %v470_v32 = vadd.f32 %v469_v30, %v400_v26 }
 0x1a9   : > { %v641_v33 = vpop.f32.mrf.mxu0 }
 0x1aa   : > { %v483_v34 = vadd.f32 %v593_v31, %v470_v32 }
 0x1ab   : > { %v472_v35 = vpop.f32.mrf.mxu0 }
 0x1ac   : > { %v601_v36 = vpack.c.bf16 %v483_v34, %v483_v34  ;;  %v473_v37 = vadd.f32 %v472_v35, %v403_v28 }
 0x1ad   : > { %v642_v38 = vpop.f32.mrf.mxu0 }
 0x1ae   : > { %494 = vst.msk [vmem:[%s245_s28] sm:$0xf] %vm493_vm3, %v601_v36  ;;  %v484_v39 = vadd.f32 %v593_v31, %v473_v37 }
 0x1b0   : > { %v602_v40 = vpack.c.bf16 %v484_v39, %v484_v39 }
 0x1b2   : > { %495 = vst.msk [vmem:[%s245_s28 + $0x4] sm:$0xf] %vm493_vm3, %v602_v40 }
 0x1b3   : > { %709 = shalt.err (!%p706_p3)
}
 0x1b4   : > { %s710_s16 = scalar_lea.hbm %s889_s11, 128  ;;  %s714_s19 = scalar_lea.hbm %s939_s6, 256 }
 0x1b5   : > { %p711_p4 = scmp.ne.s32.totalorder %s889_s11, %s710_s16  ;;  %p715_p9 = scmp.lt.s32.totalorder %s889_s11, %s939_s6 }
 0x1b6   : > { %p716_p10 = scmp.lt.s32.totalorder %s714_s19, %s710_s16 }
 0x1b7   : > { %p712_p7 = pnand %p711_p4, %p837_p5 }
 0x1b8   : > { %p717_p11 = por %p716_p10, %p715_p9 }
 0x1b9   : > { %p713_p8 = pneg %p712_p7 }
 0x1bb   : > { %p718_p12 = pnand %p717_p11, %p713_p8 }
 0x1bd   : > { %721 = shalt.err (!%p718_p12)
}
 0x1be   : > { %s762_s28 = smov 64   ;;  %s763_s9 = smov 4  }
 0x1bf   : > { %643 = dma.vmem_to_hbm [thread:$0]  (%p837_p5), %s891_s29, 128, %s889_s11, %s893_s12, %s762_s28, %s762_s28, %s763_s9  }
 0x1c0 PF: > { %p649_p13 = scmp.ge.s32.totalorder %s756_s24, 2  ;;  %s525_s10 = sand.u32 1, %s744_s21  }
 0x1c1   : > { %s526_s25 = scalar_lea.sflag [#allocation3], %s525_s10 }
 0x1c2   : > { %p646_p0 = pnand %p649_p13, %p841_p6 }
 0x1c4   : > { %p647_p1 = pneg %p646_p0 }
 0x1c6   : > { %739 = dma.done.wait (%p647_p1), %s526_s25, 128  }
 0x1c7   : > { %741 = vsyncadd (%p647_p1), %s526_s25, 4294967168  ;;  %p16_p2 = scmp.ge.s32.totalorder %s824_s27, 4   ;;  %s942_s21 = smov %s748_s22 }
 0x1c8   : > { %s943_s22 = smov %s752_s23  ;;  %s944_s23 = smov %s835_s30 }
 0x1c9   : > { %s945_s24 = smov %s824_s27  ;;  %18 = sbr.rel (!%p16_p2) target bundleno = 3 (0x3), region = 79 }
 0x1ce   :  { %531 = vsyncpa [#allocation3], 1 }
 0x1cf   :  { %533 = vsyncpa [#allocation3 + $0x1], 1 }

// kernel: tpu_custom_call.1
= control target key start
LH: loop header
LB: loop body
LE: loop exit
PB: predicated region body
PF: predicated region fallthrough
CT: control target
= control target key end

     0   :  { %11 = vsyncpa [#allocation3], 0  ;;  %s933_s0 = inlined_call_operand.vmem [shape: bf16[32,32], index: 0, kind: input, shape index: {}]   ;;  %s934_s1 = inlined_call_operand.vmem [shape: bf16[32,64], index: 1, kind: input, shape index: {}]   ;;  %s935_s2 = inlined_call_operand.vmem [shape: f32[1,64], index: 2, kind: input, shape index: {}]   ;;  %s936_s3 = inlined_call_operand.vmem [shape: bf16[64,48], index: 3, kind: input, shape index: {}]   ;;  %s937_s4 = inlined_call_operand.vmem [shape: f32[1,48], index: 4, kind: input, shape index: {}]   ;;  %s938_s5 = inlined_call_operand.vmem [shape: bf16[32,48], index: 5, kind: input, shape index: {}]   ;;  %s939_s6 = inlined_call_operand.hbm [shape: bf16[32,48], index: 6, kind: output, shape index: {}]  }
   0x1   :  { %13 = vsyncpa [#allocation3 + $0x1], 0  ;;  %s799_s21 = smov 0   ;;  %s801_s22 = smov 0  }
   0x2   :  { %s803_s23 = smov 0   ;;  %s805_s24 = smov 0  }
   0x3 LB: > { %s820_s25 = sadd.s32 4294967295, %s756_s24   ;;  %s572_s26 = sadd.s32 4294967294, %s756_s24   ;;  %s756_s24 = sphi %s805_s24, %s945_s24   ;;  %s752_s23 = sphi %s803_s23, %s944_s23   ;;  %s748_s22 = sphi %s801_s22, %s943_s22   ;;  %s744_s21 = sphi %s799_s21, %s942_s21  }
   0x4   : > { %s824_s27 = sadd.s32 1, %s756_s24   ;;  %s157_s28 = sadd.s32 1, %s752_s23 }
   0x5   : > { %s154_s29 = ssub.s32 %s756_s24, %s824_s27  ;;  %p167_p0 = scmp.ne.s32.totalorder %s752_s23, %s748_s22 }
   0x6   : > { %p155_p1 = scmp.eq.s32.totalorder %s154_s29, 0  ;;  %p168_p2 = scmp.eq.s32.totalorder %s820_s25, 1 }
   0x7   : > { %p173_p3 = scmp.ne.s32.totalorder %s748_s22, %s744_s21  ;;  %p174_p4 = scmp.eq.s32.totalorder %s572_s26, 1 }
   0x8   : > { %s835_s30 = scalar_select %p155_p1, %s752_s23, %s157_s28  }
   0x9   : > { %p837_p5 = por %p168_p2, %p167_p0  ;;  %p841_p6 = por %p174_p4, %p173_p3 }
   0xa   : > { %p575_p7 = scmp.ge.s32.totalorder %s756_s24, 1  ;;  %p216_p8 = scmp.lt.s32.totalorder %s756_s24, 3 }
   0xc   : > { %p217_p9 = pnand %p575_p7, %p216_p8 }
   0xd   : > { %s577_s13 = sshll.u32 (!%p217_p9), %s820_s25, 1  ;;  %s243_s17 = sand.u32 (!%p217_p9), 1, %s748_s22  }
   0xe   : > { %220 = sbr.rel (%p217_p9) target bundleno = 448 (0x1c0), region = 44  ;;  %p247_p10 = scmp.lt.s32.totalorder (!%p217_p9), %s577_s13, 3 }
   0xf   : > { %s576_s20 = sshll.u32 (!%p217_p9), %s243_s17, 3  ;;  %s603_s26 = sshll.u32 (!%p217_p9), %s820_s25, 7 }
  0x10   : > { %s245_s28 = scalar_lea.vmem (!%p217_p9), [#allocation2], %s576_s20  ;;  %s889_s11 = scalar_lea.hbm (!%p217_p9), %s939_s6, %s603_s26 }
  0x11   : > { %s510_s29 = sshll.u32 (!%p217_p9), %s245_s28, 4  ;;  %s893_s12 = scalar_lea.sflag (!%p217_p9), [#allocation3], %s243_s17  ;;  %s891_s29 = int_to_ptr.vmem [resolvable:$true] %s510_s29 }
  0x12   : > { %s696_s25 = scalar_lea.vmem (!%p217_p9), %s891_s29, 128 }
  0x13   : > { %v687_v0 = vld [vmem:[%s934_s1 + $0x8] sm:$0xff]   ;;  %v758_v1 = vmov 0.0   ;;  %v688_v2 = vld [vmem:[%s934_s1] sm:$0xff]   ;;  %vm759_vm0 = vmmov 0   ;;  %v690_v3 = vld [vmem:[%s936_s3 + $0x18] sm:$0xff]   ;;  %s947_s13 = smov (!%p247_p10, %s577_s13), 3  ;;  %p697_p11 = scmp.ne.s32.totalorder %s891_s29, %s696_s25 }
  0x14   : > { %615 = vmatprep.subr.bf16.mxu1 %v758_v1  ;;  %631 = vmatprep.subr.bf16.mxu0 %v758_v1  ;;  %s578_s16 = sshll.u32 %s947_s13, 2  ;;  %v760_v6 = vmov 0   ;;  %vm286_vm1 = vcmask 261120   ;;  %v691_v10 = vld [vmem:[%s938_s5 + $0x8] sm:$0xff]   ;;  %v692_v12 = vld [vmem:[%s936_s3 + $0x10] sm:$0xff]   ;;  %v693_v13 = vld [vmem:[%s938_s5] sm:$0xff]  }
  0x15   : > { %616 = vmatpush3.bf16.msra.mxu1 %v687_v0  ;;  %619 = vmatprep.mubr.msk.bf16.mxu1 %vm759_vm0, %v758_v1  ;;  %s250_s19 = scalar_lea.vmem %s933_s0, %s578_s16  ;;  %v694_v14 = vld [vmem:[%s936_s3 + $0x8] sm:$0xff]   ;;  %v695_v15 = vld [vmem:[%s936_s3] sm:$0xff]   ;;  %vm431_vm2 = vcmask 523264   ;;  %vm493_vm3 = vcmask 388096   ;;  %p698_p12 = pnand %p697_p11, %p837_p5 }
  0x16   : > { %617 = vmatprep.subr.bf16.mxu1 %v758_v1  ;;  %639 = vmatprep.mubr.msk.bf16.mxu0 %vm759_vm0, %v758_v1  ;;  %v254_v4 = vld [vmem:[%s250_s19] sm:$0xf]  ;;  %v255_v5 = vld [vmem:[%s250_s19 + $0x4] sm:$0xf]  ;;  %s761_s13 = smov [#allocation2]  }
  0x17   : > { %632 = vmatpush3.bf16.msra.mxu0 %v690_v3  ;;  %v256_v7 = vmax.bf16 %v760_v6, %v254_v4  ;;  %v257_v8 = vmax.bf16 %v760_v6, %v255_v5  ;;  %v584_v9 = vcombine.low %v254_v4, %v255_v5  ;;  %v579_v16 = vld [vmem:[%s935_s2] ss:$0 sm:$0xff]  ;;  %p699_p13 = pneg %p698_p12  ;;  %s700_s14 = sshll.u32 %s761_s13, 4  ;;  %s701_s14 = int_to_ptr.vmem [resolvable:$false] %s700_s14 }
  0x18   : > { %633 = vmatprep.subr.bf16.mxu0 %v758_v1  ;;  %v593_v31 = vld [vmem:[%s937_s4] ss:$0 sm:$0xff]  ;;  %s702_s15 = scalar_lea.vmem %s701_s14, 256  ;;  %p703_p0 = scmp.lt.s32.totalorder %s891_s29, %s701_s14 }
  0x19   : > { %618 = vmatpush3.bf16.msra.mxu1 %v688_v2  ;;  %v580_v11 = vcombine.low %v256_v7, %v257_v8  ;;  %p704_p1 = scmp.lt.s32.totalorder %s702_s15, %s696_s25 }
  0x1a   : > { %623 = vmatprep.subr.bf16.mxu1 %v758_v1 }
  0x1b   : > { %634 = vmatpush3.bf16.msra.mxu0 %v692_v12  ;;  %p705_p2 = por %p704_p1, %p703_p0 }
  0x1c   : > { %620 = vmatmul.mubr.msk.bf16.vlgmr.msra.gmra.mxu1 %vm286_vm1, %v580_v11  ;;  %635 = vmatprep.subr.bf16.mxu0 %v758_v1 }
  0x1d   : > { %624 = vmatpush3.bf16.msra.mxu1 %v691_v10  ;;  %627 = vmatprep.mubr.msk.bf16.mxu1 %vm759_vm0, %v758_v1  ;;  %p706_p3 = pnand %p705_p2, %p699_p13 }
  0x1e   : > { %625 = vmatprep.subr.bf16.mxu1 %v758_v1 }
  0x1f   : > { %636 = vmatpush3.bf16.msra.mxu0 %v694_v14 }
  0x20   : > { %637 = vmatprep.subr.bf16.mxu0 %v758_v1 }
  0x21   : > { %626 = vmatpush3.bf16.msra.mxu1 %v693_v13 }
  0x23   : > { %638 = vmatpush3.bf16.msra.mxu0 %v695_v15 }
  0x24   : > { %628 = vmatmul.mubr.msk.bf16.vlgmr.msra.gmra.mxu1 %vm286_vm1, %v584_v9 }
  0xdc   : > { %v324_v17 = vpop.f32.mrf.mxu1 }
  0xdd   : > { %v325_v19 = vadd.f32 %v579_v16, %v324_v17 }
  0xde   : > { %v621_v18 = vpop.f32.mrf.mxu1 }
  0xdf   : > { %v331_v23 = vmax.f32 %v325_v19, 0.0 }
  0xe0   : > { %v327_v20 = vpop.f32.mrf.mxu1 }
  0xe1   : > { %v328_v21 = vadd.f32 %v579_v16, %v327_v20 }
  0xe2   : > { %v622_v22 = vpop.f32.mrf.mxu1 }
  0xe3   : > { %v332_v24 = vmax.f32 %v328_v21, 0.0 }
  0xe4   : > { %v400_v26 = vpop.f32.mrf.mxu1 }
  0xe5   : > { %v333_v25 = vpack.c.bf16 %v332_v24, %v331_v23 }
  0xe6   : > { %v629_v27 = vpop.f32.mrf.mxu1 }
  0xe7   : > { %640 = vmatmul.mubr.msk.bf16.vlgmr.msra.gmra.mxu0 %vm431_vm2, %v333_v25 }
  0xe8   : > { %v403_v28 = vpop.f32.mrf.mxu1 }
  0xea   : > { %v630_v29 = vpop.f32.mrf.mxu1 }
 0x1a7   : > { %v469_v30 = vpop.f32.mrf.mxu0 }
 0x1a8   : > { %v470_v32 = vadd.f32 %v469_v30, %v400_v26 }
 0x1a9   : > { %v641_v33 = vpop.f32.mrf.mxu0 }
 0x1aa   : > { %v483_v34 = vadd.f32 %v593_v31, %v470_v32 }
 0x1ab   : > { %v472_v35 = vpop.f32.mrf.mxu0 }
 0x1ac   : > { %v601_v36 = vpack.c.bf16 %v483_v34, %v483_v34  ;;  %v473_v37 = vadd.f32 %v472_v35, %v403_v28 }
 0x1ad   : > { %v642_v38 = vpop.f32.mrf.mxu0 }
 0x1ae   : > { %494 = vst.msk [vmem:[%s245_s28] sm:$0xf] %vm493_vm3, %v601_v36  ;;  %v484_v39 = vadd.f32 %v593_v31, %v473_v37 }
 0x1b0   : > { %v602_v40 = vpack.c.bf16 %v484_v39, %v484_v39 }
 0x1b2   : > { %495 = vst.msk [vmem:[%s245_s28 + $0x4] sm:$0xf] %vm493_vm3, %v602_v40 }
 0x1b3   : > { %709 = shalt.err (!%p706_p3)
}
 0x1b4   : > { %s710_s16 = scalar_lea.hbm %s889_s11, 128  ;;  %s714_s19 = scalar_lea.hbm %s939_s6, 256 }
 0x1b5   : > { %p711_p4 = scmp.ne.s32.totalorder %s889_s11, %s710_s16  ;;  %p715_p9 = scmp.lt.s32.totalorder %s889_s11, %s939_s6 }
 0x1b6   : > { %p716_p10 = scmp.lt.s32.totalorder %s714_s19, %s710_s16 }
 0x1b7   : > { %p712_p7 = pnand %p711_p4, %p837_p5 }
 0x1b8   : > { %p717_p11 = por %p716_p10, %p715_p9 }
 0x1b9   : > { %p713_p8 = pneg %p712_p7 }
 0x1bb   : > { %p718_p12 = pnand %p717_p11, %p713_p8 }
 0x1bd   : > { %721 = shalt.err (!%p718_p12)
}
 0x1be   : > { %s762_s28 = smov 64   ;;  %s763_s9 = smov 4  }
 0x1bf   : > { %643 = dma.vmem_to_hbm [thread:$0]  (%p837_p5), %s891_s29, 128, %s889_s11, %s893_s12, %s762_s28, %s762_s28, %s763_s9  }
 0x1c0 PF: > { %p649_p13 = scmp.ge.s32.totalorder %s756_s24, 2  ;;  %s525_s10 = sand.u32 1, %s744_s21  }
 0x1c1   : > { %s526_s25 = scalar_lea.sflag [#allocation3], %s525_s10 }
 0x1c2   : > { %p646_p0 = pnand %p649_p13, %p841_p6 }
 0x1c4   : > { %p647_p1 = pneg %p646_p0 }
 0x1c6   : > { %739 = dma.done.wait (%p647_p1), %s526_s25, 128  }
 0x1c7   : > { %741 = vsyncadd (%p647_p1), %s526_s25, 4294967168  ;;  %p16_p2 = scmp.ge.s32.totalorder %s824_s27, 4   ;;  %s942_s21 = smov %s748_s22 }
 0x1c8   : > { %s943_s22 = smov %s752_s23  ;;  %s944_s23 = smov %s835_s30 }
 0x1c9   : > { %s945_s24 = smov %s824_s27  ;;  %18 = sbr.rel (!%p16_p2) target bundleno = 3 (0x3), region = 79 }
 0x1ce   :  { %531 = vsyncpa [#allocation3], 1 }
 0x1cf   :  { %533 = vsyncpa [#allocation3 + $0x1], 1 }

</bundles_post_ra>
